<compile_context>
chip_gen: v7x
topology: tpu7x:2x2x1
jax: 0.10.0
libtpu: 0.0.40
codegen_flags: <defaults>
</compile_context>

<pallas_src>
import functools

import jax
import jax.numpy as jnp
from jax.experimental import pallas as pl
from jax.experimental.pallas import tpu as pltpu

_LN4 = 1.3862943611198906  # ln(4)
_EPS = 1e-14
_LANE = 128
_SUB = 8
_NUM_CORES = 2  # leading "parallel" grid axis (2 TCs on v7x; harmless elsewhere)


def _attn_loss_kernel(x_ref, t_ref, npos_ref, s1_ref, stot_ref, *,
                      rows, tiles_per_core, num_tiles, full_tiles):
    c = pl.program_id(0)
    i = pl.program_id(1)
    tile_idx = c * tiles_per_core + i      # logical (unclamped) tile index
    tm = x_ref.shape[0]

    # Per-core accumulator init at the start of this core's reduction pass.
    @pl.when(i == 0)
    def _init():
        npos_ref[...] = jnp.zeros_like(npos_ref)
        s1_ref[...] = jnp.zeros_like(s1_ref)
        stot_ref[...] = jnp.zeros_like(stot_ref)

    def vreg_reduce(v):
        # (tm,128) -> (tm//8, 8, 128) splits the sublane axis (layout no-op);
        # the leading-axis sum is pure vreg adds — no XLU cross-lane reduce.
        return jnp.sum(v.reshape(tm // _SUB, _SUB, _LANE), axis=0)

    def accumulate(x, is_pos):
        # x: f32 predictions, is_pos: bool labels (binary-label assumption).
        p = jnp.clip(x, _EPS, 1.0)              # 1 - 1e-14 rounds to 1.0 in f32
        sel_p = jnp.where(is_pos, 1.0 - p, p)   # positives use 1-p, negatives p
        sel_x = jnp.where(is_pos, x, 1.0 - x)   # matching BCE log argument
        w = jnp.exp(_LN4 * jnp.sqrt(sel_p))             # 4 ** sqrt(sel_p) (EUP)
        bce = -jnp.maximum(jnp.log(sel_x), -100.0)      # torch log clamp (EUP)
        contrib = w * bce
        pos_f = is_pos.astype(jnp.float32)

        npos_ref[...] += vreg_reduce(pos_f)
        s1_ref[...] += vreg_reduce(jnp.where(is_pos, contrib, 0.0))
        stot_ref[...] += vreg_reduce(contrib)

    # Fast path: fully in-range tile, no mask / no iota.
    @pl.when(tile_idx < full_tiles)
    def _interior():
        accumulate(x_ref[...].astype(jnp.float32), t_ref[...] > 0)

    # Ragged last tile (only generated if it exists — static decision).
    # Rows past `rows` hold unspecified data from the partial block; sanitize
    # them to x=0, label=0 which contributes exactly zero to every sum
    # (sel_x = 1 -> bce = 0, pos_f = 0).  The explicit zero-pad between n and
    # rows*128 contributes zero the same way, so no element-level mask needed.
    if full_tiles < num_tiles:
        rows_in_tail = rows - full_tiles * tm   # static, 0 < rows_in_tail < tm

        @pl.when(tile_idx == full_tiles)
        def _tail():
            row = jax.lax.broadcasted_iota(jnp.int32, (tm, _LANE), 0)
            valid = row < rows_in_tail
            x = jnp.where(valid, x_ref[...].astype(jnp.float32), 0.0)
            is_pos = jnp.logical_and(valid, t_ref[...] > 0)
            accumulate(x, is_pos)

    # Logical tiles with tile_idx >= num_tiles (clamped duplicates from the
    # 2-core split) fall through both pl.when's: zero compute.


@functools.partial(jax.jit, static_argnames=("tm",))
def attention_loss_single_map(output, label, tm=4096):
    """Pallas TPU implementation of AttentionLossSingleMap.forward.

    output: NCHW probabilities in [0,1]; label: same-shape binary {0,1} labels
    (any dtype: f32 / bf16 / int8 / bool — loaded without widening).
    Returns a scalar float32 loss.
    """
    assert tm % _SUB == 0 and tm > 0
    assert output.shape == label.shape
    batch_size = output.shape[0]
    n = int(output.size)  # static under jit

    x = output.reshape(-1)   # keep native dtypes; cast/compare happen in-kernel
    t = label.reshape(-1)

    # Pad flat length only up to a multiple of 8*128 so the 2-D slab is
    # (8,128)-tile aligned.  For typical NCHW shapes pad == 0 (no copy).
    chunk = _SUB * _LANE
    n_pad = -(-n // chunk) * chunk
    pad = n_pad - n
    if pad:
        x = jnp.pad(x, (0, pad))
        t = jnp.pad(t, (0, pad))

    rows = n_pad // _LANE                  # multiple of 8
    x = x.reshape(rows, _LANE)             # zero-copy reshape
    t = t.reshape(rows, _LANE)

    tm_eff = min(tm, rows)                 # both multiples of 8
    num_tiles = -(-rows // tm_eff)         # total logical tiles
    full_tiles = rows // tm_eff            # tiles fully inside `rows`
    tiles_per_core = -(-num_tiles // _NUM_CORES)

    def in_map(c, i):
        idx = c * tiles_per_core + i
        # Clamp so the DMA never walks past the array; out-of-range logical
        # tiles are skipped inside the kernel (and their DMA is a revisit).
        return (jnp.minimum(idx, num_tiles - 1), 0)

    tile_spec = pl.BlockSpec((tm_eff, _LANE), in_map)
    acc_spec = pl.BlockSpec((None, _SUB, _LANE), lambda c, i: (c, 0, 0))
    acc_shape = jax.ShapeDtypeStruct((_NUM_CORES, _SUB, _LANE), jnp.float32)

    kernel = functools.partial(
        _attn_loss_kernel, rows=rows, tiles_per_core=tiles_per_core,
        num_tiles=num_tiles, full_tiles=full_tiles)

    npos, s1, stot = pl.pallas_call(
        kernel,
        out_shape=(acc_shape, acc_shape, acc_shape),
        grid_spec=pltpu.PrefetchScalarGridSpec(
            num_scalar_prefetch=0,
            grid=(_NUM_CORES, tiles_per_core),
            in_specs=[tile_spec, tile_spec],
            out_specs=(acc_spec, acc_spec, acc_spec),
        ),
        compiler_params=pltpu.CompilerParams(
            dimension_semantics=("parallel", "arbitrary"),
            vmem_limit_bytes=48 * 1024 * 1024),
    )(x, t)

    # Single final cross-lane/sublane reduce, outside the kernel.
    num_pos = jnp.sum(npos)
    s1 = jnp.sum(s1)
    s2 = jnp.sum(stot) - s1

    n_f = jnp.float32(n)
    num_neg = n_f - num_pos          # exact for binary labels
    alpha = num_neg / n_f            # == num_neg / (num_pos + num_neg)
    loss_focal = alpha * s1 + (1.0 - alpha) * s2
    return loss_focal / batch_size


def _reference_loss(output, label):
    """Pure-JAX reference of the PyTorch module (for verification)."""
    output = output.astype(jnp.float32)
    label = label.astype(jnp.float32)
    batch_size = output.shape[0]
    num_pos = jnp.sum(label == 1.0).astype(jnp.float32)
    num_neg = jnp.sum(label == 0.0).astype(jnp.float32)
    alpha = num_neg / (num_pos + num_neg)
    p = jnp.clip(output, _EPS, 1.0 - _EPS)
    w = (label * alpha * jnp.exp(_LN4 * jnp.sqrt(1.0 - p))
         + (1.0 - label) * (1.0 - alpha) * jnp.exp(_LN4 * jnp.sqrt(p)))
    bce = -(label * jnp.maximum(jnp.log(output), -100.0)
            + (1.0 - label) * jnp.maximum(jnp.log(1.0 - output), -100.0))
    return jnp.sum(w * bce) / batch_size


def _make_inputs(key, shape):
    k_out, k_lbl = jax.random.split(key)
    out = jax.nn.sigmoid(jax.random.normal(k_out, shape, jnp.float32))
    lbl = jax.random.bernoulli(k_lbl, 0.3, shape).astype(jnp.float32)
    return out, lbl


if __name__ == "__main__":
    key = jax.random.PRNGKey(0)
    k0, k1, k2 = jax.random.split(key, 3)

    # 1) Canonical small NCHW case (aligned, single tile, fast path only).
    out_a, lbl_a = _make_inputs(k0, (2, 4, 16, 16))
    loss_a = jax.block_until_ready(attention_loss_single_map(out_a, lbl_a))
    ref_a = jax.block_until_ready(_reference_loss(out_a, lbl_a))
    assert jnp.allclose(loss_a, ref_a, rtol=1e-4, atol=1e-4), (loss_a, ref_a)

    # 2) Non-aligned element count + small tm: exercises the zero-pad region
    #    and the ragged-last-tile masked path (rows=24, tm=16 -> 1 full + 1 ragged).
    out_b, lbl_b = _make_inputs(k1, (1, 1, 40, 64))
    loss_b = jax.block_until_ready(attention_loss_single_map(out_b, lbl_b, tm=16))
    ref_b = jax.block_until_ready(_reference_loss(out_b, lbl_b))
    assert jnp.allclose(loss_b, ref_b, rtol=1e-4, atol=1e-4), (loss_b, ref_b)

    # 3) Odd tile count: exercises the skipped out-of-range duplicate tile on
    #    the second logical core (rows=48, tm=16 -> 3 tiles over a (2,2) grid).
    out_c, lbl_c = _make_inputs(k2, (1, 1, 48, 128))
    loss_c = jax.block_until_ready(attention_loss_single_map(out_c, lbl_c, tm=16))
    ref_c = jax.block_until_ready(_reference_loss(out_c, lbl_c))
    assert jnp.allclose(loss_c, ref_c, rtol=1e-4, atol=1e-4), (loss_c, ref_c)

    print("KERNEL_OK")
</pallas_src>

<mosaic_0001>
module attributes {stable_mosaic.version = 11 : i64} {
  func.func @_attn_loss_kernel(%arg0: i32, %arg1: i32, %arg2: memref<16x128xf32, #tpu.memory_space<vmem>>, %arg3: memref<16x128xf32, #tpu.memory_space<vmem>>, %arg4: memref<1x8x128xf32, #tpu.memory_space<vmem>>, %arg5: memref<1x8x128xf32, #tpu.memory_space<vmem>>, %arg6: memref<1x8x128xf32, #tpu.memory_space<vmem>>) attributes {dimension_semantics = [#tpu.dimension_semantics<parallel>, #tpu.dimension_semantics<arbitrary>], iteration_bounds = array<i64: 2, 1>, scalar_prefetch = 0 : i64, scratch_operands = 0 : i64, tpu.core_type = #tpu.core_type<tc>, window_params = [{transform_indices = @transform_0, window_bounds = array<i64: 16, 128>}, {transform_indices = @transform_1, window_bounds = array<i64: 16, 128>}, {transform_indices = @transform_2, window_bounds = array<i64: 1, 8, 128>}, {transform_indices = @transform_3, window_bounds = array<i64: 1, 8, 128>}, {transform_indices = @transform_4, window_bounds = array<i64: 1, 8, 128>}]} {
    %c1_i32 = arith.constant 1 : i32
    %0 = arith.muli %arg0, %c1_i32 : i32
    %1 = arith.addi %0, %arg1 : i32
    %c0_i32 = arith.constant 0 : i32
    %2 = arith.cmpi eq, %arg1, %c0_i32 : i32
    %3 = arith.extui %2 : i1 to i32
    %c0_i32_0 = arith.constant 0 : i32
    %4 = arith.cmpi ne, %3, %c0_i32_0 : i32
    scf.if %4 {
      %cst = arith.constant 0.000000e+00 : f32
      %8 = vector.broadcast %cst : f32 to vector<8x128xf32>
      %c0 = arith.constant 0 : index
      %c0_3 = arith.constant 0 : index
      %c0_4 = arith.constant 0 : index
      %9 = vector.load %arg4[%c0, %c0_3, %c0_4] : memref<1x8x128xf32, #tpu.memory_space<vmem>>, vector<1x8x128xf32>
      %10 = vector.shape_cast %9 : vector<1x8x128xf32> to vector<8x128xf32>
      %11 = vector.shape_cast %8 : vector<8x128xf32> to vector<1x8x128xf32>
      tpu.vector_store %arg4[%c0, %c0_3, %c0_4], %11 {strides = array<i32>} : memref<1x8x128xf32, #tpu.memory_space<vmem>>, vector<1x8x128xf32>,
      %cst_5 = arith.constant 0.000000e+00 : f32
      %12 = vector.broadcast %cst_5 : f32 to vector<8x128xf32>
      %c0_6 = arith.constant 0 : index
      %c0_7 = arith.constant 0 : index
      %c0_8 = arith.constant 0 : index
      %13 = vector.load %arg5[%c0_6, %c0_7, %c0_8] : memref<1x8x128xf32, #tpu.memory_space<vmem>>, vector<1x8x128xf32>
      %14 = vector.shape_cast %13 : vector<1x8x128xf32> to vector<8x128xf32>
      %15 = vector.shape_cast %12 : vector<8x128xf32> to vector<1x8x128xf32>
      tpu.vector_store %arg5[%c0_6, %c0_7, %c0_8], %15 {strides = array<i32>} : memref<1x8x128xf32, #tpu.memory_space<vmem>>, vector<1x8x128xf32>,
      %cst_9 = arith.constant 0.000000e+00 : f32
      %16 = vector.broadcast %cst_9 : f32 to vector<8x128xf32>
      %c0_10 = arith.constant 0 : index
      %c0_11 = arith.constant 0 : index
      %c0_12 = arith.constant 0 : index
      %17 = vector.load %arg6[%c0_10, %c0_11, %c0_12] : memref<1x8x128xf32, #tpu.memory_space<vmem>>, vector<1x8x128xf32>
      %18 = vector.shape_cast %17 : vector<1x8x128xf32> to vector<8x128xf32>
      %19 = vector.shape_cast %16 : vector<8x128xf32> to vector<1x8x128xf32>
      tpu.vector_store %arg6[%c0_10, %c0_11, %c0_12], %19 {strides = array<i32>} : memref<1x8x128xf32, #tpu.memory_space<vmem>>, vector<1x8x128xf32>,
    } else {
    }
    %c1_i32_1 = arith.constant 1 : i32
    %5 = arith.cmpi slt, %1, %c1_i32_1 : i32
    %6 = arith.extui %5 : i1 to i32
    %c0_i32_2 = arith.constant 0 : i32
    %7 = arith.cmpi ne, %6, %c0_i32_2 : i32
    scf.if %7 {
      %c0 = arith.constant 0 : index
      %c0_3 = arith.constant 0 : index
      %8 = vector.load %arg2[%c0, %c0_3] : memref<16x128xf32, #tpu.memory_space<vmem>>, vector<16x128xf32>
      %c0_4 = arith.constant 0 : index
      %c0_5 = arith.constant 0 : index
      %9 = vector.load %arg3[%c0_4, %c0_5] : memref<16x128xf32, #tpu.memory_space<vmem>>, vector<16x128xf32>
      %cst = arith.constant 0.000000e+00 : f32
      %10 = vector.broadcast %cst : f32 to vector<16x128xf32>
      %11 = arith.cmpf ogt, %9, %10 : vector<16x128xf32>
      %cst_6 = arith.constant 9.99999982E-15 : f32
      %cst_7 = arith.constant 1.000000e+00 : f32
      %12 = vector.broadcast %cst_6 : f32 to vector<16x128xf32>
      %13 = arith.maximumf %12, %8 : vector<16x128xf32>
      %14 = vector.broadcast %cst_7 : f32 to vector<16x128xf32>
      %15 = arith.minimumf %14, %13 : vector<16x128xf32>
      %cst_8 = arith.constant 1.000000e+00 : f32
      %16 = vector.broadcast %cst_8 : f32 to vector<16x128xf32>
      %17 = arith.subf %16, %15 : vector<16x128xf32>
      %18 = arith.select %11, %17, %15 : vector<16x128xi1>, vector<16x128xf32>
      %cst_9 = arith.constant 1.000000e+00 : f32
      %19 = vector.broadcast %cst_9 : f32 to vector<16x128xf32>
      %20 = arith.subf %19, %8 : vector<16x128xf32>
      %21 = arith.select %11, %8, %20 : vector<16x128xi1>, vector<16x128xf32>
      %22 = math.sqrt %18 : vector<16x128xf32>
      %cst_10 = arith.constant 1.38629436 : f32
      %23 = vector.broadcast %cst_10 : f32 to vector<16x128xf32>
      %24 = arith.mulf %23, %22 : vector<16x128xf32>
      %25 = math.exp %24 : vector<16x128xf32>
      %26 = math.log %21 : vector<16x128xf32>
      %cst_11 = arith.constant -1.000000e+02 : f32
      %27 = vector.broadcast %cst_11 : f32 to vector<16x128xf32>
      %28 = arith.maximumf %26, %27 : vector<16x128xf32>
      %cst_12 = arith.constant 0.000000e+00 : f32
      %29 = vector.broadcast %cst_12 : f32 to vector<16x128xf32>
      %30 = arith.subf %29, %28 : vector<16x128xf32>
      %31 = arith.mulf %25, %30 : vector<16x128xf32>
      %32 = arith.extui %11 : vector<16x128xi1> to vector<16x128xi32>
      %33 = arith.sitofp %32 : vector<16x128xi32> to vector<16x128xf32>
      %c0_13 = arith.constant 0 : index
      %c0_14 = arith.constant 0 : index
      %c0_15 = arith.constant 0 : index
      %34 = vector.load %arg4[%c0_13, %c0_14, %c0_15] : memref<1x8x128xf32, #tpu.memory_space<vmem>>, vector<1x8x128xf32>
      %35 = vector.shape_cast %34 : vector<1x8x128xf32> to vector<8x128xf32>
      %36 = vector.shape_cast %33 : vector<16x128xf32> to vector<2x8x128xf32>
      %cst_16 = arith.constant dense<0.000000e+00> : vector<8x128xf32>
      %37 = vector.multi_reduction <add>, %36, %cst_16 [0] : vector<2x8x128xf32> to vector<8x128xf32>
      %38 = arith.addf %35, %37 : vector<8x128xf32>
      %c0_17 = arith.constant 0 : index
      %c0_18 = arith.constant 0 : index
      %c0_19 = arith.constant 0 : index
      %39 = vector.load %arg4[%c0_17, %c0_18, %c0_19] : memref<1x8x128xf32, #tpu.memory_space<vmem>>, vector<1x8x128xf32>
      %40 = vector.shape_cast %39 : vector<1x8x128xf32> to vector<8x128xf32>
      %41 = vector.shape_cast %38 : vector<8x128xf32> to vector<1x8x128xf32>
      tpu.vector_store %arg4[%c0_17, %c0_18, %c0_19], %41 {strides = array<i32>} : memref<1x8x128xf32, #tpu.memory_space<vmem>>, vector<1x8x128xf32>,
      %c0_20 = arith.constant 0 : index
      %c0_21 = arith.constant 0 : index
      %c0_22 = arith.constant 0 : index
      %42 = vector.load %arg5[%c0_20, %c0_21, %c0_22] : memref<1x8x128xf32, #tpu.memory_space<vmem>>, vector<1x8x128xf32>
      %43 = vector.shape_cast %42 : vector<1x8x128xf32> to vector<8x128xf32>
      %cst_23 = arith.constant 0.000000e+00 : f32
      %44 = vector.broadcast %cst_23 : f32 to vector<16x128xf32>
      %45 = arith.select %11, %31, %44 : vector<16x128xi1>, vector<16x128xf32>
      %46 = vector.shape_cast %45 : vector<16x128xf32> to vector<2x8x128xf32>
      %cst_24 = arith.constant dense<0.000000e+00> : vector<8x128xf32>
      %47 = vector.multi_reduction <add>, %46, %cst_24 [0] : vector<2x8x128xf32> to vector<8x128xf32>
      %48 = arith.addf %43, %47 : vector<8x128xf32>
      %c0_25 = arith.constant 0 : index
      %c0_26 = arith.constant 0 : index
      %c0_27 = arith.constant 0 : index
      %49 = vector.load %arg5[%c0_25, %c0_26, %c0_27] : memref<1x8x128xf32, #tpu.memory_space<vmem>>, vector<1x8x128xf32>
      %50 = vector.shape_cast %49 : vector<1x8x128xf32> to vector<8x128xf32>
      %51 = vector.shape_cast %48 : vector<8x128xf32> to vector<1x8x128xf32>
      tpu.vector_store %arg5[%c0_25, %c0_26, %c0_27], %51 {strides = array<i32>} : memref<1x8x128xf32, #tpu.memory_space<vmem>>, vector<1x8x128xf32>,
      %c0_28 = arith.constant 0 : index
      %c0_29 = arith.constant 0 : index
      %c0_30 = arith.constant 0 : index
      %52 = vector.load %arg6[%c0_28, %c0_29, %c0_30] : memref<1x8x128xf32, #tpu.memory_space<vmem>>, vector<1x8x128xf32>
      %53 = vector.shape_cast %52 : vector<1x8x128xf32> to vector<8x128xf32>
      %54 = vector.shape_cast %31 : vector<16x128xf32> to vector<2x8x128xf32>
      %cst_31 = arith.constant dense<0.000000e+00> : vector<8x128xf32>
      %55 = vector.multi_reduction <add>, %54, %cst_31 [0] : vector<2x8x128xf32> to vector<8x128xf32>
      %56 = arith.addf %53, %55 : vector<8x128xf32>
      %c0_32 = arith.constant 0 : index
      %c0_33 = arith.constant 0 : index
      %c0_34 = arith.constant 0 : index
      %57 = vector.load %arg6[%c0_32, %c0_33, %c0_34] : memref<1x8x128xf32, #tpu.memory_space<vmem>>, vector<1x8x128xf32>
      %58 = vector.shape_cast %57 : vector<1x8x128xf32> to vector<8x128xf32>
      %59 = vector.shape_cast %56 : vector<8x128xf32> to vector<1x8x128xf32>
      tpu.vector_store %arg6[%c0_32, %c0_33, %c0_34], %59 {strides = array<i32>} : memref<1x8x128xf32, #tpu.memory_space<vmem>>, vector<1x8x128xf32>,
    } else {
    }
    return
  }
  func.func @transform_0(%arg0: i32, %arg1: i32) -> (i32, i32) {
    %c1_i32 = arith.constant 1 : i32
    %0 = arith.muli %arg0, %c1_i32 : i32
    %1 = arith.addi %0, %arg1 : i32
    %c0_i32 = arith.constant 0 : i32
    %2 = arith.minsi %1, %c0_i32 : i32
    %c0_i32_0 = arith.constant 0 : i32
    %c0_i32_1 = arith.constant 0 : i32
    return %2, %c0_i32_0 : i32, i32
  }
  func.func @transform_1(%arg0: i32, %arg1: i32) -> (i32, i32) {
    %c1_i32 = arith.constant 1 : i32
    %0 = arith.muli %arg0, %c1_i32 : i32
    %1 = arith.addi %0, %arg1 : i32
    %c0_i32 = arith.constant 0 : i32
    %2 = arith.minsi %1, %c0_i32 : i32
    %c0_i32_0 = arith.constant 0 : i32
    %c0_i32_1 = arith.constant 0 : i32
    return %2, %c0_i32_0 : i32, i32
  }
  func.func @transform_2(%arg0: i32, %arg1: i32) -> (i32, i32, i32) {
    %c0_i32 = arith.constant 0 : i32
    %c0_i32_0 = arith.constant 0 : i32
    %c0_i32_1 = arith.constant 0 : i32
    return %arg0, %c0_i32, %c0_i32_0 : i32, i32, i32
  }
  func.func @transform_3(%arg0: i32, %arg1: i32) -> (i32, i32, i32) {
    %c0_i32 = arith.constant 0 : i32
    %c0_i32_0 = arith.constant 0 : i32
    %c0_i32_1 = arith.constant 0 : i32
    return %arg0, %c0_i32, %c0_i32_0 : i32, i32, i32
  }
  func.func @transform_4(%arg0: i32, %arg1: i32) -> (i32, i32, i32) {
    %c0_i32 = arith.constant 0 : i32
    %c0_i32_0 = arith.constant 0 : i32
    %c0_i32_1 = arith.constant 0 : i32
    return %arg0, %c0_i32, %c0_i32_0 : i32, i32, i32
  }
}

</mosaic_0001>

<bundles_post_ra>
// kernel: attention_loss_single_map.1
= control target key start
LH: loop header
LB: loop body
LE: loop exit
PB: predicated region body
PF: predicated region fallthrough
CT: control target
= control target key end

     0   :  { %s614_s15 = smov 0   ;;  %s616_s16 = smov 0   ;;  %s679_s0 = inlined_call_operand.vmem [shape: f32[16,128], index: 0, kind: input, shape index: {}]   ;;  %s680_s1 = inlined_call_operand.vmem [shape: f32[16,128], index: 1, kind: input, shape index: {}]   ;;  %s681_s2 = inlined_call_operand.vmem [shape: f32[2,8,128], index: 2, kind: output, shape index: {0}]   ;;  %s682_s3 = inlined_call_operand.vmem [shape: f32[2,8,128], index: 3, kind: output, shape index: {1}]   ;;  %s683_s4 = inlined_call_operand.vmem [shape: f32[2,8,128], index: 4, kind: output, shape index: {2}]  }
   0x1   :  { %s618_s17 = smov 0  }
   0x2 LB: > { %s27_s18 = sadd.s32 1, %s581_s16  ;;  %p512_p0 = scmp.ge.s32.totalorder %s585_s17, 1  ;;  %s585_s17 = sphi %s618_s17, %s15_s17   ;;  %s581_s16 = sphi %s616_s16, %s685_s16   ;;  %s577_s15 = sphi %s614_s15, %s684_s15  }
   0x3   : > { %p29_p1 = scmp.ge.s32.totalorder %s27_s18, 2  ;;  %p215_p2 = scmp.lt.s32.totalorder %s585_s17, 3 }
   0x5   : > { %s687_s18 = smov (%p29_p1, %s27_s18), 0  ;;  %p216_p3 = pnand %p512_p0, %p215_p2 }
   0x6   : > { %p260_p4 = scmp.lt.s32.totalorder (!%p216_p3), %s577_s15, 0  ;;  %p283_p5 = scmp.lt.s32.totalorder (!%p216_p3), %s577_s15, 1  ;;  %v587_v0 = vmov (!%p216_p3), 0.0  }
   0x7   : > { %219 = sbr.rel (%p216_p3) target bundleno = 69 (0x45), region = 28  ;;  %p520_p7 = scmp.ge.s32.totalorder (!%p216_p3), %s577_s15, 1 }
   0xe   : > { %s261_s19 = scalar_select %p260_p4, %s577_s15, 0 }
   0xf   : > { %s284_s20 = scalar_select %p283_p5, %s577_s15, 1 }
  0x10   : > { %s513_s21 = sshll.u32 %s261_s19, 1  ;;  %306 = sbr.rel (%p520_p7) target bundleno = 69 (0x45), region = 36  ;;  %v588_v7 = vmov (!%p520_p7), 0.0  }
  0x11   : > { %p263_p6 = scmp.lt.s32.totalorder %s513_s21, 1  ;;  %s517_s22 = sshll.u32 %s284_s20, 3 }
  0x12   : > { %s635_s25 = scalar_lea.vmem %s681_s2, %s517_s22  ;;  %s640_s28 = scalar_lea.vmem %s682_s3, %s517_s22 }
  0x13   : > { %s689_s21 = smov (!%p263_p6, %s513_s21), 1  ;;  %300 = vst [vmem:[%s635_s25] sm:$0xff] %v587_v0  ;;  %301 = vst [vmem:[%s640_s28] sm:$0xff] %v587_v0  ;;  %s647_s5 = scalar_lea.vmem %s683_s4, %s517_s22 }
  0x14   : > { %s514_s6 = sshll.u32 %s689_s21, 3  ;;  %302 = vst [vmem:[%s647_s5] sm:$0xff] %v587_v0 }
  0x15   : > { %s266_s9 = scalar_lea.vmem %s679_s0, %s514_s6  ;;  %s278_s12 = scalar_lea.vmem %s680_s1, %s514_s6 }
  0x16   : > { %v307_v1 = vld [vmem:[%s266_s9] sm:$0xff] (!%p520_p7)  ;;  %v308_v2 = vld [vmem:[%s266_s9 + $0x8] sm:$0xff] (!%p520_p7) }
  0x17   : > { %v309_v3 = vld [vmem:[%s278_s12] sm:$0xff]  ;;  %v310_v4 = vld [vmem:[%s278_s12 + $0x8] sm:$0xff]  ;;  %v313_v5 = vmax.f32 %v307_v1, 1e-14  ;;  %v314_v6 = vmax.f32 %v308_v2, 1e-14 }
  0x18   : > { %vm311_vm0 = vcmp.gt.f32.partialorder %v309_v3, 0.0  ;;  %vm312_vm1 = vcmp.gt.f32.partialorder %v310_v4, 0.0  ;;  %v321_v17 = vsub.f32 1.0, %v307_v1  ;;  %v322_v20 = vsub.f32 1.0, %v308_v2 }
  0x19   : > { %v521_v8 = vsel %vm311_vm0, 1.0, %v588_v7  ;;  %v315_v9 = vmin.f32 %v313_v5, 1.0  ;;  %v316_v10 = vmin.f32 %v314_v6, 1.0  ;;  %v522_v11 = vsel %vm312_vm1, 1.0, %v588_v7 }
  0x1a   : > { %v359_v12 = vld [vmem:[%s635_s25] sm:$0xff]  ;;  %v360_v13 = vadd.f32 %v522_v11, %v521_v8  ;;  %v323_v21 = vsel %vm311_vm0, %v307_v1, %v321_v17  ;;  %v324_v22 = vsel %vm312_vm1, %v308_v2, %v322_v20 }
  0x1b   : > { %v317_v14 = vsub.f32 1.0, %v315_v9  ;;  %v318_v15 = vsub.f32 1.0, %v316_v10  ;;  %v369_v50 = vld [vmem:[%s647_s5] sm:$0xff] }
  0x1c   : > { %v361_v16 = vadd.f32 %v360_v13, %v359_v12  ;;  %v363_v51 = vld [vmem:[%s640_s28] sm:$0xff] }
  0x1d   : > { %v319_v18 = vsel %vm311_vm0, %v317_v14, %v315_v9  ;;  %v320_v19 = vsel %vm312_vm1, %v318_v15, %v316_v10 }
  0x1e   : > { %551 = vrsqrt.f32 %v319_v18  ;;  %362 = vst [vmem:[%s635_s25] sm:$0xff] %v361_v16  ;;  %vm327_vm2 = vcmp.eq.f32.partialorder %v319_v18, inf  ;;  %v330_v24 = vand.u32 2147483648, %v319_v18  ;;  %vm334_vm3 = vcmp.eq.f32.partialorder %v320_v19, inf }
  0x1f   : > { %553 = vrsqrt.f32 %v320_v19  ;;  %v337_v27 = vand.u32 2147483648, %v320_v19  ;;  %vm329_vm4 = vcmp.eq.f32.partialorder %v319_v18, 0.0  ;;  %vm336_vm5 = vcmp.eq.f32.partialorder %v320_v19, 0.0 }
  0x20   : > { %555 = vlog2.f32 %v323_v21 }
  0x21   : > { %557 = vlog2.f32 %v324_v22 }
  0x28   : > { %v552_v23 = vpop.eup %551 }
  0x29   : > { %v554_v25 = vpop.eup %553  ;;  %v326_v26 = vmul.f32 %v552_v23, %v319_v18 }
  0x2a   : > { %v333_v28 = vmul.f32 %v554_v25, %v320_v19  ;;  %v556_v32 = vpop.eup %555 }
  0x2b   : > { %v328_v29 = vsel %vm327_vm2, %v319_v18, %v326_v26  ;;  %v558_v35 = vpop.eup %557  ;;  %v346_v39 = vmul.f32 0.6931472, %v556_v32 }
  0x2c   : > { %v331_v30 = vsel %vm329_vm4, %v330_v24, %v328_v29  ;;  %v335_v31 = vsel %vm334_vm3, %v320_v19, %v333_v28  ;;  %v348_v40 = vmul.f32 0.6931472, %v558_v35 }
  0x2d   : > { %v338_v33 = vsel %vm336_vm5, %v337_v27, %v335_v31  ;;  %v339_v34 = vmul.f32 1.3862944, %v331_v30  ;;  %v349_v41 = vmax.f32 %v346_v39, -100.0 }
  0x2e   : > { %v340_v36 = vmul.f32 1.3862944, %v338_v33  ;;  %v350_v42 = vmax.f32 %v348_v40, -100.0 }
  0x2f   : > { %v341_v37 = vmul.f32 1.442695, %v339_v34  ;;  %v351_v43 = vsub.f32 0.0, %v349_v41 }
  0x30   : > { %v343_v38 = vmul.f32 1.442695, %v340_v36  ;;  %v352_v44 = vsub.f32 0.0, %v350_v42 }
  0x31   : > { %559 = vpow2.f32 %v341_v37 }
  0x32   : > { %561 = vpow2.f32 %v343_v38 }
  0x3b   : > { %v560_v45 = vpop.eup %559 }
  0x3c   : > { %v562_v46 = vpop.eup %561  ;;  %v353_v47 = vmul.f32 %v560_v45, %v351_v43 }
  0x3d   : > { %v354_v48 = vmul.f32 %v562_v46, %v352_v44 }
  0x3e   : > { %v364_v49 = vsel %vm311_vm0, %v353_v47, 0.0 }
  0x3f   : > { %v365_v52 = vsel %vm312_vm1, %v354_v48, 0.0  ;;  %v370_v53 = vadd.f32 %v354_v48, %v353_v47 }
  0x40   : > { %v366_v54 = vadd.f32 %v365_v52, %v364_v49 }
  0x41   : > { %v371_v55 = vadd.f32 %v370_v53, %v369_v50 }
  0x42   : > { %v367_v56 = vadd.f32 %v366_v54, %v363_v51 }
  0x43   : > { %372 = vst [vmem:[%s647_s5] sm:$0xff] %v371_v55 }
  0x44   : > { %368 = vst [vmem:[%s640_s28] sm:$0xff] %v367_v56 }
  0x45 PF: > { %s15_s17 = sadd.s32 1, %s585_s17   ;;  %s684_s15 = smov %s581_s16 }
  0x46   : > { %p12_p8 = scmp.ge.s32.totalorder %s15_s17, 4   ;;  %s685_s16 = smov %s687_s18 }
  0x48   :  { %14 = sbr.rel (!%p12_p8) target bundleno = 2 (0x2), region = 93 }

</bundles_post_ra>
